<compile_context>
chip_gen: v6e
topology: v6e:2x2x1
jax: 0.10.0
libtpu: 0.0.40
codegen_flags: <defaults>
</compile_context>

<pallas_src>
import jax
import jax.numpy as jnp
from jax.experimental import pallas as pl
from jax.experimental.pallas import tpu as pltpu


def _unfold_to_lbk(x, kh, kw, padding, stride):
    """torch.nn.Unfold semantics, emitted directly in (L, B, K) layout.

    K ordering matches torch: c-major, then kernel row i, then kernel col j.
    """
    B, C, H, W = x.shape
    xp = jnp.pad(x, ((0, 0), (0, 0), (padding, padding), (padding, padding)))
    OH = (H + 2 * padding - kh) // stride + 1
    OW = (W + 2 * padding - kw) // stride + 1
    taps = []
    for i in range(kh):
        for j in range(kw):
            taps.append(xp[:, :, i:i + stride * OH:stride, j:j + stride * OW:stride])
    p = jnp.stack(taps, axis=2)                      # (B, C, kh*kw, OH, OW)
    p = p.reshape(B, C * kh * kw, OH * OW)           # (B, K, L)  -- torch unfold order
    p = jnp.transpose(p, (2, 0, 1))                  # (L, B, K)
    return p, OH, OW


def _untied_conv_kernel(p_ref, w_ref, b_ref, o_ref):
    # p_ref: (TL, B, K)      patches for TL output positions
    # w_ref: (TL, K, Opad)   per-position weight slabs (O padded to lane width)
    # b_ref: (TL, 1, Opad)   per-position bias rows (f32)
    # o_ref: (TL, B, Opad)   f32 output
    acc = jnp.einsum("lbk,lko->lbo", p_ref[...], w_ref[...],
                     preferred_element_type=jnp.float32)      # batched MXU matmul
    o_ref[...] = (acc + b_ref[...]).astype(o_ref.dtype)


def untied_conv_forward(x, weights, bias, kernel_size, padding=0, stride=1,
                        compute_dtype=None, vmem_budget_bytes=24 * (1 << 20)):
    """x: (B, C, H, W); weights: (C*kh*kw*L, O); bias: (1, O, OH, OW).

    compute_dtype: dtype patches/weights are streamed in (e.g. jnp.bfloat16);
                   accumulation is always f32.
    """
    kh, kw = kernel_size
    B, C, _, _ = x.shape
    patches_lbk, OH, OW = _unfold_to_lbk(x, kh, kw, padding, stride)
    K = C * kh * kw
    L = OH * OW
    O = weights.shape[1]
    assert weights.shape[0] == K * L, "kernel_num must equal OH*OW for UntiedConv"

    cdt = compute_dtype if compute_dtype is not None else x.dtype
    isz = jnp.dtype(cdt).itemsize

    # ---- lane-dense O: pad out_channels up to a multiple of 128 --------------
    O_pad = pl.cdiv(O, 128) * 128
    w_lko = weights.reshape(L, K, O).astype(cdt)                       # (L, K, O)
    bias_l1o = jnp.transpose(bias.reshape(O, L), (1, 0)).reshape(L, 1, O)
    bias_l1o = bias_l1o.astype(jnp.float32)
    if O_pad != O:
        w_lko = jnp.pad(w_lko, ((0, 0), (0, 0), (0, O_pad - O)))
        bias_l1o = jnp.pad(bias_l1o, ((0, 0), (0, 0), (0, O_pad - O)))

    patches_lbk = patches_lbk.astype(cdt)

    # ---- pick TL from a double-buffered VMEM budget --------------------------
    # per-L-row bytes: patches + weights (streamed dtype) + bias + f32 output
    per_l_bytes = (B * K * isz) + (K * O_pad * isz) + (O_pad * 4) + (B * O_pad * 4)
    tl_max = max(1, vmem_budget_bytes // (2 * per_l_bytes))   # 2x for double buffering
    TL = int(min(L, tl_max))
    steps = pl.cdiv(L, TL)
    L_pad = steps * TL
    if L_pad != L:
        dL = L_pad - L
        patches_lbk = jnp.pad(patches_lbk, ((0, dL), (0, 0), (0, 0)))
        w_lko = jnp.pad(w_lko, ((0, dL), (0, 0), (0, 0)))
        bias_l1o = jnp.pad(bias_l1o, ((0, dL), (0, 0), (0, 0)))

    cost = pl.CostEstimate(
        flops=2 * B * L_pad * K * O_pad,
        transcendentals=0,
        bytes_accessed=(L_pad * B * K + L_pad * K * O_pad) * isz
                       + (L_pad * O_pad + L_pad * B * O_pad) * 4,
    )

    out_lbo = pl.pallas_call(
        _untied_conv_kernel,
        out_shape=jax.ShapeDtypeStruct((L_pad, B, O_pad), jnp.float32),
        grid_spec=pltpu.PrefetchScalarGridSpec(
            num_scalar_prefetch=0,
            grid=(steps,),
            in_specs=[
                pl.BlockSpec((TL, B, K), lambda l: (l, 0, 0)),
                pl.BlockSpec((TL, K, O_pad), lambda l: (l, 0, 0)),
                pl.BlockSpec((TL, 1, O_pad), lambda l: (l, 0, 0)),
            ],
            out_specs=pl.BlockSpec((TL, B, O_pad), lambda l: (l, 0, 0)),
        ),
        compiler_params=pltpu.CompilerParams(
            dimension_semantics=("parallel",),
            vmem_limit_bytes=64 * (1 << 20),
        ),
        cost_estimate=cost,
    )(patches_lbk, w_lko, bias_l1o)

    # slice off L / O padding; fold((OH,OW),(1,1)) == reshape; back to (B, O, OH, OW)
    out = out_lbo[:L, :, :O]
    out = jnp.transpose(out, (1, 2, 0)).reshape(B, O, OH, OW)
    return out


def _reference(x, weights, bias, kernel_size, padding, stride):
    kh, kw = kernel_size
    patches_lbk, OH, OW = _unfold_to_lbk(x, kh, kw, padding, stride)
    L, B, K = patches_lbk.shape
    O = weights.shape[1]
    w_lko = weights.reshape(L, K, O)
    out_lbo = jnp.einsum("lbk,lko->lbo", patches_lbk, w_lko)
    out = jnp.transpose(out_lbo, (1, 2, 0)).reshape(B, O, OH, OW)
    return out + bias


if __name__ == "__main__":
    # Small shapes consistent with the module: kernel_num == OH*OW.
    B, C, H, W = 2, 4, 8, 8
    kh, kw = 3, 3
    out_channels = 8
    padding, stride = 0, 1
    OH = (H + 2 * padding - kh) // stride + 1
    OW = (W + 2 * padding - kw) // stride + 1
    L = OH * OW                     # kernel_num
    K = C * kh * kw

    key = jax.random.PRNGKey(0)
    kx, kw_key, kb_key = jax.random.split(key, 3)

    x = jax.random.normal(kx, (B, C, H, W), dtype=jnp.float32)

    # Deterministic xavier-uniform-style init (synthetic; not a checkpoint load).
    w_bound = (6.0 / (K * L + out_channels)) ** 0.5
    weights = jax.random.uniform(kw_key, (K * L, out_channels),
                                 minval=-w_bound, maxval=w_bound, dtype=jnp.float32)
    b_bound = (6.0 / (out_channels * OH * OW + OH * OW)) ** 0.5
    bias = jax.random.uniform(kb_key, (1, out_channels, OH, OW),
                              minval=-b_bound, maxval=b_bound, dtype=jnp.float32)

    ref = _reference(x, weights, bias, (kh, kw), padding, stride)

    # f32 streaming (exact path)
    out = untied_conv_forward(x, weights, bias, (kh, kw), padding, stride)
    out = jax.block_until_ready(out)
    assert out.shape == (B, out_channels, OH, OW)
    assert jnp.allclose(out, ref, atol=1e-5, rtol=1e-5)

    # bf16 streaming (halves dominant weight HBM bytes), f32 accumulation
    out_bf16 = untied_conv_forward(x, weights, bias, (kh, kw), padding, stride,
                                   compute_dtype=jnp.bfloat16)
    out_bf16 = jax.block_until_ready(out_bf16)
    assert jnp.allclose(out_bf16, ref, atol=2e-2, rtol=2e-2)

    print("KERNEL_OK")
</pallas_src>

<mosaic_0001>
module attributes {stable_mosaic.version = 11 : i64} {
  func.func @_untied_conv_kernel(%arg0: i32, %arg1: memref<36x2x36xf32, #tpu.memory_space<vmem>>, %arg2: memref<36x36x128xf32, #tpu.memory_space<vmem>>, %arg3: memref<36x1x128xf32, #tpu.memory_space<vmem>>, %arg4: memref<36x2x128xf32, #tpu.memory_space<vmem>>) attributes {dimension_semantics = [#tpu.dimension_semantics<parallel>], iteration_bounds = array<i64: 1>, scalar_prefetch = 0 : i64, scratch_operands = 0 : i64, tpu.core_type = #tpu.core_type<tc>, window_params = [{transform_indices = @transform_0, window_bounds = array<i64: 36, 2, 36>}, {transform_indices = @transform_1, window_bounds = array<i64: 36, 36, 128>}, {transform_indices = @transform_2, window_bounds = array<i64: 36, 1, 128>}, {transform_indices = @transform_3, window_bounds = array<i64: 36, 2, 128>}]} {
    %c0 = arith.constant 0 : index
    %c0_0 = arith.constant 0 : index
    %c0_1 = arith.constant 0 : index
    %0 = vector.load %arg1[%c0, %c0_0, %c0_1] : memref<36x2x36xf32, #tpu.memory_space<vmem>>, vector<36x2x36xf32>
    %c0_2 = arith.constant 0 : index
    %c0_3 = arith.constant 0 : index
    %c0_4 = arith.constant 0 : index
    %1 = vector.load %arg2[%c0_2, %c0_3, %c0_4] : memref<36x36x128xf32, #tpu.memory_space<vmem>>, vector<36x36x128xf32>
    "tpu.trace_start"() <{level = 10 : i32, message = "lbk,lko->lbo"}> : () -> ()
    %cst = arith.constant dense<0.000000e+00> : vector<36x2x128xf32>
    %2 = tpu.matmul %0, %1, %cst {dimension_numbers = #tpu.dot_dimension_numbers<[2], [1], [1], [2], [0, 0, 0, 1, 1, 2], [0], [0]>} : vector<36x2x36xf32>, vector<36x36x128xf32>, vector<36x2x128xf32> -> vector<36x2x128xf32>
    "tpu.trace_stop"() : () -> ()
    %c0_5 = arith.constant 0 : index
    %c0_6 = arith.constant 0 : index
    %c0_7 = arith.constant 0 : index
    %3 = vector.load %arg3[%c0_5, %c0_6, %c0_7] : memref<36x1x128xf32, #tpu.memory_space<vmem>>, vector<36x1x128xf32>
    %4 = vector.broadcast %3 : vector<36x1x128xf32> to vector<36x2x128xf32>
    %5 = arith.addf %2, %4 : vector<36x2x128xf32>
    %c0_8 = arith.constant 0 : index
    %c0_9 = arith.constant 0 : index
    %c0_10 = arith.constant 0 : index
    %6 = vector.load %arg4[%c0_8, %c0_9, %c0_10] : memref<36x2x128xf32, #tpu.memory_space<vmem>>, vector<36x2x128xf32>
    tpu.vector_store %arg4[%c0_8, %c0_9, %c0_10], %5 {strides = array<i32>} : memref<36x2x128xf32, #tpu.memory_space<vmem>>, vector<36x2x128xf32>,
    return
  }
  func.func @transform_0(%arg0: i32) -> (i32, i32, i32) {
    %c0_i32 = arith.constant 0 : i32
    %c0_i32_0 = arith.constant 0 : i32
    %c0_i32_1 = arith.constant 0 : i32
    return %arg0, %c0_i32, %c0_i32_0 : i32, i32, i32
  }
  func.func @transform_1(%arg0: i32) -> (i32, i32, i32) {
    %c0_i32 = arith.constant 0 : i32
    %c0_i32_0 = arith.constant 0 : i32
    %c0_i32_1 = arith.constant 0 : i32
    return %arg0, %c0_i32, %c0_i32_0 : i32, i32, i32
  }
  func.func @transform_2(%arg0: i32) -> (i32, i32, i32) {
    %c0_i32 = arith.constant 0 : i32
    %c0_i32_0 = arith.constant 0 : i32
    %c0_i32_1 = arith.constant 0 : i32
    return %arg0, %c0_i32, %c0_i32_0 : i32, i32, i32
  }
  func.func @transform_3(%arg0: i32) -> (i32, i32, i32) {
    %c0_i32 = arith.constant 0 : i32
    %c0_i32_0 = arith.constant 0 : i32
    %c0_i32_1 = arith.constant 0 : i32
    return %arg0, %c0_i32, %c0_i32_0 : i32, i32, i32
  }
}

</mosaic_0001>

<bundles_post_ra>
// kernel: tpu_custom_call.1
= control target key start
LH: loop header
LB: loop body
LE: loop exit
PB: predicated region body
PF: predicated region fallthrough
CT: control target
= control target key end

     0   :  { %8 = vsyncpa [#allocation3], 0  ;;  %s4580_s0 = inlined_call_operand.hbm [shape: f32[36,2,36], index: 0, kind: input, shape index: {}]   ;;  %s4581_s1 = inlined_call_operand.hbm [shape: f32[36,36,128], index: 1, kind: input, shape index: {}]   ;;  %s4582_s2 = inlined_call_operand.hbm [shape: f32[36,1,128], index: 2, kind: input, shape index: {}]   ;;  %s4583_s3 = inlined_call_operand.hbm [shape: f32[36,2,128], index: 3, kind: output, shape index: {}]  }
   0x1   :  { %9 = vsyncpa [#allocation6], 0 }
   0x2   :  { %10 = vsyncpa [#allocation4], 0  ;;  %s4206_s12 = smov [#allocation5]  }
   0x3   :  { %s28_s13 = sshll.u32 %s4206_s12, 4  ;;  %s29_s13 = int_to_ptr.vmem [resolvable:$true] %s28_s13 }
   0x4   :  { %s4128_s14 = scalar_lea.vmem %s29_s13, 23040  ;;  %p4133_p1 = scmp.lt.s32.totalorder %s29_s13, %s29_s13 }
   0x5   :  { %p4129_p0 = scmp.ne.s32.totalorder %s29_s13, %s4128_s14  ;;  %p4134_p2 = scmp.lt.s32.totalorder %s4128_s14, %s4128_s14 }
   0x7   :  { %p4135_p3 = por %p4134_p2, %p4133_p1 }
   0x9   :  { %p4136_p4 = pnand %p4135_p3, %p4129_p0 }
   0xb   :  { %4139 = shalt.err (!%p4136_p4)
}
   0xc   :  { %s4207_s15 = smov 128   ;;  %s4208_s16 = smov 8  }
   0xd   :  { %34 = dma.hbm_to_vmem [thread:$0]  %s4581_s1, 23040, %s29_s13, [#allocation6], %s4207_s15, %s4207_s15, %s4208_s16  }
   0xe   :  { %s4209_s19 = smov [#allocation2]  }
   0xf   :  { %s16_s20 = sshll.u32 %s4209_s19, 4  ;;  %s17_s20 = int_to_ptr.vmem [resolvable:$true] %s16_s20 }
  0x10   :  { %s4148_s21 = scalar_lea.vmem %s17_s20, 1152  ;;  %p4153_p6 = scmp.lt.s32.totalorder %s17_s20, %s17_s20 }
  0x11   :  { %p4149_p5 = scmp.ne.s32.totalorder %s17_s20, %s4148_s21  ;;  %p4154_p7 = scmp.lt.s32.totalorder %s4148_s21, %s4148_s21 }
  0x13   :  { %p4155_p8 = por %p4154_p7, %p4153_p6 }
  0x15   :  { %p4156_p9 = pnand %p4155_p8, %p4149_p5 }
  0x17   :  { %4159 = shalt.err (!%p4156_p9)
}
  0x18   :  { %s4210_s22 = smov 32   ;;  %s4211_s23 = smov 2  }
  0x19   :  { %22 = dma.hbm_to_vmem [thread:$0]  %s4580_s0, 1152, %s17_s20, [#allocation3], %s4210_s22, %s4210_s22, %s4211_s23  }
  0x1a   :  { %s4212_s1 = smov [#allocation7]  }
  0x1b   :  { %s40_s26 = sshll.u32 %s4212_s1, 4  ;;  %s41_s26 = int_to_ptr.vmem [resolvable:$true] %s40_s26 }
  0x1c   :  { %s4168_s27 = scalar_lea.vmem %s41_s26, 576  ;;  %p4173_p11 = scmp.lt.s32.totalorder %s41_s26, %s41_s26 }
  0x1d   :  { %p4169_p10 = scmp.ne.s32.totalorder %s41_s26, %s4168_s27  ;;  %p4174_p12 = scmp.lt.s32.totalorder %s4168_s27, %s4168_s27 }
  0x1f   :  { %p4175_p13 = por %p4174_p12, %p4173_p11 }
  0x21   :  { %p4176_p0 = pnand %p4175_p13, %p4169_p10 }
  0x23   :  { %4179 = shalt.err (!%p4176_p0)
}
  0x24   :  { %s4213_s28 = smov 16   ;;  %s4214_s29 = smov 1  }
  0x25   :  { %46 = dma.hbm_to_vmem [thread:$0]  %s4582_s2, 576, %s41_s26, [#allocation6], %s4213_s28, %s4213_s28, %s4214_s29  }
  0x26   :  { %4200 = dma.done.wait [#allocation3], 1152  }
  0x27   :  { %4201 = vsyncadd [#allocation3], 4294966144 }
  0x28   :  { %4202 = dma.done.wait [#allocation6], 23616  }
  0x29   :  { %4203 = vsyncadd [#allocation6], 4294943680  ;;  %v4215_v0 = vmov 0.0   ;;  %vm4216_vm0 = vmmov 0   ;;  %vm528_vm1 = vcmask 1043456   ;;  %v95_v3 = vld [vmem:[#allocation5 + $0x18] sm:$0xff] }
  0x2a   :  { %3640 = vmatprep.subr.mxu0 %v4215_v0  ;;  %3653 = vmatprep.subr.mxu1 %v4215_v0  ;;  %v96_v1 = vld [vmem:[#allocation5 + $0x20] sm:$0xf]  ;;  %v101_v2 = vld [vmem:[#allocation5 + $0x48] sm:$0xf]  ;;  %v94_v5 = vld [vmem:[#allocation5 + $0x10] sm:$0xff]  ;;  %vm524_vm2 = vcmask 293888  }
  0x2b   :  { %3650 = vmatprep.mubr.msk.f32.mxu0 %vm4216_vm0, %v4215_v0  ;;  %3663 = vmatprep.mubr.msk.f32.mxu1 %vm4216_vm0, %v4215_v0  ;;  %v100_v4 = vld [vmem:[#allocation5 + $0x40] sm:$0xff]  ;;  %v99_v6 = vld [vmem:[#allocation5 + $0x38] sm:$0xff]  ;;  %v93_v7 = vld [vmem:[#allocation5 + $0x8] sm:$0xff]  ;;  %s4217_s0 = smov [#allocation8]  }
  0x2c   :  { %3641 = vmatpush3.msk.msra.mxu0 %vm528_vm1, %v96_v1  ;;  %3654 = vmatpush3.msk.msra.mxu1 %vm528_vm1, %v101_v2  ;;  %v98_v8 = vld [vmem:[#allocation5 + $0x30] sm:$0xff]  ;;  %v92_v9 = vld [vmem:[#allocation5] sm:$0xff]  ;;  %v97_v10 = vld [vmem:[#allocation5 + $0x28] sm:$0xff]  ;;  %s3303_s2 = sshll.u32 %s4217_s0, 4  ;;  %s3304_s2 = int_to_ptr.vmem [resolvable:$true] %s3303_s2 }
  0x2d   :  { %3642 = vmatprep.subr.mxu0 %v4215_v0  ;;  %3655 = vmatprep.subr.mxu1 %v4215_v0  ;;  %v56_v11 = vld [vmem:[#allocation2] sm:$0x3]  ;;  %v57_v12 = vld [vmem:[#allocation2 + $0x2] sm:$0x3]  ;;  %v106_v13 = vld [vmem:[#allocation5 + $0x70] sm:$0xf]  ;;  %p4185_p2 = scmp.lt.s32.totalorder %s3304_s2, %s3304_s2 }
  0x2e   :  { %3643 = vmatpush3.msra.mxu0 %v95_v3  ;;  %3656 = vmatpush3.msra.mxu1 %v100_v4  ;;  %v111_v14 = vld [vmem:[#allocation5 + $0x98] sm:$0xf]  ;;  %v105_v15 = vld [vmem:[#allocation5 + $0x68] sm:$0xff]  ;;  %v110_v16 = vld [vmem:[#allocation5 + $0x90] sm:$0xff]  ;;  %s4180_s5 = scalar_lea.vmem %s3304_s2, 1152 }
  0x2f   :  { %3644 = vmatprep.subr.mxu0 %v4215_v0  ;;  %3657 = vmatprep.subr.mxu1 %v4215_v0  ;;  %v104_v17 = vld [vmem:[#allocation5 + $0x60] sm:$0xff]  ;;  %v109_v18 = vld [vmem:[#allocation5 + $0x88] sm:$0xff]  ;;  %v103_v19 = vld [vmem:[#allocation5 + $0x58] sm:$0xff]  ;;  %p4181_p1 = scmp.ne.s32.totalorder %s3304_s2, %s4180_s5  ;;  %p4186_p3 = scmp.lt.s32.totalorder %s4180_s5, %s4180_s5 }
  0x30   :  { %3645 = vmatpush3.msra.mxu0 %v94_v5  ;;  %3658 = vmatpush3.msra.mxu1 %v99_v6  ;;  %v108_v20 = vld [vmem:[#allocation5 + $0x80] sm:$0xff]  ;;  %v102_v21 = vld [vmem:[#allocation5 + $0x50] sm:$0xff]  ;;  %v107_v22 = vld [vmem:[#allocation5 + $0x78] sm:$0xff] }
  0x31   :  { %3646 = vmatprep.subr.mxu0 %v4215_v0  ;;  %3659 = vmatprep.subr.mxu1 %v4215_v0  ;;  %v58_v23 = vld [vmem:[#allocation2 + $0x4] sm:$0x3]  ;;  %v59_v24 = vld [vmem:[#allocation2 + $0x6] sm:$0x3]  ;;  %v116_v25 = vld [vmem:[#allocation5 + $0xc0] sm:$0xf]  ;;  %p4187_p4 = por %p4186_p3, %p4185_p2 }
  0x32   :  { %3647 = vmatpush3.msra.mxu0 %v93_v7  ;;  %3660 = vmatpush3.msra.mxu1 %v98_v8  ;;  %v121_v26 = vld [vmem:[#allocation5 + $0xe8] sm:$0xf]  ;;  %v115_v27 = vld [vmem:[#allocation5 + $0xb8] sm:$0xff]  ;;  %v120_v28 = vld [vmem:[#allocation5 + $0xe0] sm:$0xff] }
  0x33   :  { %3648 = vmatprep.subr.mxu0 %v4215_v0  ;;  %3661 = vmatprep.subr.mxu1 %v4215_v0  ;;  %v114_v29 = vld [vmem:[#allocation5 + $0xb0] sm:$0xff]  ;;  %v119_v30 = vld [vmem:[#allocation5 + $0xd8] sm:$0xff]  ;;  %v113_v31 = vld [vmem:[#allocation5 + $0xa8] sm:$0xff]  ;;  %p4188_p5 = pnand %p4187_p4, %p4181_p1 }
  0x34   :  { %3649 = vmatpush3.msra.mxu0 %v92_v9  ;;  %3662 = vmatpush3.msra.mxu1 %v97_v10  ;;  %v118_v32 = vld [vmem:[#allocation5 + $0xd0] sm:$0xff]  ;;  %v112_v33 = vld [vmem:[#allocation5 + $0xa0] sm:$0xff]  ;;  %v117_v34 = vld [vmem:[#allocation5 + $0xc8] sm:$0xff] }
  0x35   :  { %3651 = vmatmul.mubr.msk.f32.vlgmr.msra.gmra.mxu0 %vm524_vm2, %v56_v11  ;;  %3664 = vmatmul.mubr.msk.f32.vlgmr.msra.gmra.mxu1 %vm524_vm2, %v57_v12  ;;  %v60_v35 = vld [vmem:[#allocation2 + $0x8] sm:$0x3]  ;;  %v61_v36 = vld [vmem:[#allocation2 + $0xa] sm:$0x3]  ;;  %v126_v37 = vld [vmem:[#allocation5 + $0x110] sm:$0xf] }
  0x36   :  { %3666 = vmatprep.subr.mxu0 %v4215_v0  ;;  %3679 = vmatprep.subr.mxu1 %v4215_v0  ;;  %v131_v38 = vld [vmem:[#allocation5 + $0x138] sm:$0xf]  ;;  %v125_v39 = vld [vmem:[#allocation5 + $0x108] sm:$0xff]  ;;  %v130_v40 = vld [vmem:[#allocation5 + $0x130] sm:$0xff] }
  0x37   :  { %3667 = vmatpush3.msk.msra.mxu0 %vm528_vm1, %v106_v13  ;;  %3680 = vmatpush3.msk.msra.mxu1 %vm528_vm1, %v111_v14  ;;  %v124_v41 = vld [vmem:[#allocation5 + $0x100] sm:$0xff]  ;;  %v129_v42 = vld [vmem:[#allocation5 + $0x128] sm:$0xff]  ;;  %v123_v43 = vld [vmem:[#allocation5 + $0xf8] sm:$0xff] }
  0x38   :  { %3668 = vmatprep.subr.mxu0 %v4215_v0  ;;  %3681 = vmatprep.subr.mxu1 %v4215_v0  ;;  %v128_v44 = vld [vmem:[#allocation5 + $0x120] sm:$0xff]  ;;  %v122_v45 = vld [vmem:[#allocation5 + $0xf0] sm:$0xff]  ;;  %v127_v46 = vld [vmem:[#allocation5 + $0x118] sm:$0xff] }
  0x39   :  { %3669 = vmatpush3.msra.mxu0 %v105_v15  ;;  %3682 = vmatpush3.msra.mxu1 %v110_v16  ;;  %v62_v47 = vld [vmem:[#allocation2 + $0xc] sm:$0x3]  ;;  %v63_v48 = vld [vmem:[#allocation2 + $0xe] sm:$0x3]  ;;  %v136_v49 = vld [vmem:[#allocation5 + $0x160] sm:$0xf] }
  0x3a   :  { %3670 = vmatprep.subr.mxu0 %v4215_v0  ;;  %3683 = vmatprep.subr.mxu1 %v4215_v0  ;;  %v141_v50 = vld [vmem:[#allocation5 + $0x188] sm:$0xf]  ;;  %v135_v51 = vld [vmem:[#allocation5 + $0x158] sm:$0xff]  ;;  %v140_v52 = vld [vmem:[#allocation5 + $0x180] sm:$0xff] }
  0x3b   :  { %3671 = vmatpush3.msra.mxu0 %v104_v17  ;;  %3684 = vmatpush3.msra.mxu1 %v109_v18  ;;  %v134_v53 = vld [vmem:[#allocation5 + $0x150] sm:$0xff]  ;;  %v139_v54 = vld [vmem:[#allocation5 + $0x178] sm:$0xff]  ;;  %v133_v55 = vld [vmem:[#allocation5 + $0x148] sm:$0xff] }
  0x3c   :  { %3672 = vmatprep.subr.mxu0 %v4215_v0  ;;  %3685 = vmatprep.subr.mxu1 %v4215_v0  ;;  %v138_v56 = vld [vmem:[#allocation5 + $0x170] sm:$0xff]  ;;  %v132_v57 = vld [vmem:[#allocation5 + $0x140] sm:$0xff]  ;;  %v137_v58 = vld [vmem:[#allocation5 + $0x168] sm:$0xff] }
  0x3d   :  { %3673 = vmatpush3.msra.mxu0 %v103_v19  ;;  %3686 = vmatpush3.msra.mxu1 %v108_v20  ;;  %v64_v59 = vld [vmem:[#allocation2 + $0x10] sm:$0x3]  ;;  %v65_v60 = vld [vmem:[#allocation2 + $0x12] sm:$0x3]  ;;  %v146_v61 = vld [vmem:[#allocation5 + $0x1b0] sm:$0xf] }
  0x3e   :  { %3674 = vmatprep.subr.mxu0 %v4215_v0  ;;  %3687 = vmatprep.subr.mxu1 %v4215_v0  ;;  %v151_v62 = vld [vmem:[#allocation5 + $0x1d8] sm:$0xf]  ;;  %v145_v63 = vld [vmem:[#allocation5 + $0x1a8] sm:$0xff]  ;;  %v150_v1 = vld [vmem:[#allocation5 + $0x1d0] sm:$0xff] }
  0x3f   :  { %3675 = vmatpush3.msra.mxu0 %v102_v21  ;;  %3676 = vmatprep.mubr.msk.f32.mxu0 %vm4216_vm0, %v4215_v0  ;;  %v144_v2 = vld [vmem:[#allocation5 + $0x1a0] sm:$0xff]  ;;  %v149_v3 = vld [vmem:[#allocation5 + $0x1c8] sm:$0xff]  ;;  %v143_v4 = vld [vmem:[#allocation5 + $0x198] sm:$0xff] }
  0x40   :  { %3688 = vmatpush3.msra.mxu1 %v107_v22  ;;  %3689 = vmatprep.mubr.msk.f32.mxu1 %vm4216_vm0, %v4215_v0  ;;  %v148_v5 = vld [vmem:[#allocation5 + $0x1c0] sm:$0xff]  ;;  %v142_v6 = vld [vmem:[#allocation5 + $0x190] sm:$0xff]  ;;  %v147_v7 = vld [vmem:[#allocation5 + $0x1b8] sm:$0xff] }
  0x41   :  { %3677 = vmatmul.mubr.msk.f32.vlgmr.msra.gmra.mxu0 %vm524_vm2, %v58_v23  ;;  %3690 = vmatmul.mubr.msk.f32.vlgmr.msra.gmra.mxu1 %vm524_vm2, %v59_v24  ;;  %v66_v8 = vld [vmem:[#allocation2 + $0x14] sm:$0x3]  ;;  %v67_v9 = vld [vmem:[#allocation2 + $0x16] sm:$0x3]  ;;  %v156_v10 = vld [vmem:[#allocation5 + $0x200] sm:$0xf] }
  0x42   :  { %3692 = vmatprep.subr.mxu0 %v4215_v0  ;;  %3705 = vmatprep.subr.mxu1 %v4215_v0  ;;  %v161_v11 = vld [vmem:[#allocation5 + $0x228] sm:$0xf]  ;;  %v155_v12 = vld [vmem:[#allocation5 + $0x1f8] sm:$0xff]  ;;  %v160_v13 = vld [vmem:[#allocation5 + $0x220] sm:$0xff] }
  0x43   :  { %3693 = vmatpush3.msk.msra.mxu0 %vm528_vm1, %v116_v25  ;;  %3706 = vmatpush3.msk.msra.mxu1 %vm528_vm1, %v121_v26  ;;  %v154_v14 = vld [vmem:[#allocation5 + $0x1f0] sm:$0xff]  ;;  %v159_v15 = vld [vmem:[#allocation5 + $0x218] sm:$0xff]  ;;  %v153_v16 = vld [vmem:[#allocation5 + $0x1e8] sm:$0xff] }
  0x44   :  { %3694 = vmatprep.subr.mxu0 %v4215_v0  ;;  %3707 = vmatprep.subr.mxu1 %v4215_v0  ;;  %v158_v17 = vld [vmem:[#allocation5 + $0x210] sm:$0xff]  ;;  %v152_v18 = vld [vmem:[#allocation5 + $0x1e0] sm:$0xff]  ;;  %v157_v19 = vld [vmem:[#allocation5 + $0x208] sm:$0xff] }
  0x45   :  { %3695 = vmatpush3.msra.mxu0 %v115_v27  ;;  %3708 = vmatpush3.msra.mxu1 %v120_v28  ;;  %v68_v20 = vld [vmem:[#allocation2 + $0x18] sm:$0x3]  ;;  %v69_v21 = vld [vmem:[#allocation2 + $0x1a] sm:$0x3]  ;;  %v171_v23 = vld [vmem:[#allocation5 + $0x278] sm:$0xf] }
  0x46   :  { %3696 = vmatprep.subr.mxu0 %v4215_v0  ;;  %3709 = vmatprep.subr.mxu1 %v4215_v0  ;;  %v166_v22 = vld [vmem:[#allocation5 + $0x250] sm:$0xf]  ;;  %v165_v24 = vld [vmem:[#allocation5 + $0x248] sm:$0xff]  ;;  %v164_v26 = vld [vmem:[#allocation5 + $0x240] sm:$0xff] }
  0x47   :  { %3697 = vmatpush3.msra.mxu0 %v114_v29  ;;  %3710 = vmatpush3.msra.mxu1 %v119_v30  ;;  %v170_v25 = vld [vmem:[#allocation5 + $0x270] sm:$0xff]  ;;  %v169_v27 = vld [vmem:[#allocation5 + $0x268] sm:$0xff]  ;;  %v163_v28 = vld [vmem:[#allocation5 + $0x238] sm:$0xff] }
  0x48   :  { %3698 = vmatprep.subr.mxu0 %v4215_v0  ;;  %3711 = vmatprep.subr.mxu1 %v4215_v0  ;;  %v168_v29 = vld [vmem:[#allocation5 + $0x260] sm:$0xff]  ;;  %v162_v30 = vld [vmem:[#allocation5 + $0x230] sm:$0xff] }
  0x49   :  { %3699 = vmatpush3.msra.mxu0 %v113_v31  ;;  %3712 = vmatpush3.msra.mxu1 %v118_v32  ;;  %v167_v31 = vld [vmem:[#allocation5 + $0x258] sm:$0xff]  ;;  %v70_v32 = vld [vmem:[#allocation2 + $0x1c] sm:$0x3] }
  0x4a   :  { %3700 = vmatprep.subr.mxu0 %v4215_v0  ;;  %3713 = vmatprep.subr.mxu1 %v4215_v0 }
  0x4b   :  { %3701 = vmatpush3.msra.mxu0 %v112_v33  ;;  %3702 = vmatprep.mubr.msk.f32.mxu0 %vm4216_vm0, %v4215_v0  ;;  %v71_v33 = vld [vmem:[#allocation2 + $0x1e] sm:$0x3] }
  0x4c   :  { %3714 = vmatpush3.msra.mxu1 %v117_v34  ;;  %3715 = vmatprep.mubr.msk.f32.mxu1 %vm4216_vm0, %v4215_v0  ;;  %v176_v34 = vld [vmem:[#allocation5 + $0x2a0] sm:$0xf] }
  0x4d   :  { %3703 = vmatmul.mubr.msk.f32.vlgmr.msra.gmra.mxu0 %vm524_vm2, %v60_v35  ;;  %3716 = vmatmul.mubr.msk.f32.vlgmr.msra.gmra.mxu1 %vm524_vm2, %v61_v36  ;;  %v181_v35 = vld [vmem:[#allocation5 + $0x2c8] sm:$0xf]  ;;  %v175_v36 = vld [vmem:[#allocation5 + $0x298] sm:$0xff] }
  0x4e   :  { %3718 = vmatprep.subr.mxu0 %v4215_v0  ;;  %3731 = vmatprep.subr.mxu1 %v4215_v0 }
  0x4f   :  { %3719 = vmatpush3.msk.msra.mxu0 %vm528_vm1, %v126_v37  ;;  %3732 = vmatpush3.msk.msra.mxu1 %vm528_vm1, %v131_v38  ;;  %v180_v37 = vld [vmem:[#allocation5 + $0x2c0] sm:$0xff]  ;;  %v174_v38 = vld [vmem:[#allocation5 + $0x290] sm:$0xff] }
  0x50   :  { %3720 = vmatprep.subr.mxu0 %v4215_v0  ;;  %3733 = vmatprep.subr.mxu1 %v4215_v0 }
  0x51   :  { %3721 = vmatpush3.msra.mxu0 %v125_v39  ;;  %3734 = vmatpush3.msra.mxu1 %v130_v40  ;;  %v179_v39 = vld [vmem:[#allocation5 + $0x2b8] sm:$0xff]  ;;  %v173_v40 = vld [vmem:[#allocation5 + $0x288] sm:$0xff] }
  0x52   :  { %3722 = vmatprep.subr.mxu0 %v4215_v0  ;;  %3735 = vmatprep.subr.mxu1 %v4215_v0 }
  0x53   :  { %3723 = vmatpush3.msra.mxu0 %v124_v41  ;;  %3736 = vmatpush3.msra.mxu1 %v129_v42  ;;  %v178_v41 = vld [vmem:[#allocation5 + $0x2b0] sm:$0xff]  ;;  %v172_v42 = vld [vmem:[#allocation5 + $0x280] sm:$0xff] }
  0x54   :  { %3724 = vmatprep.subr.mxu0 %v4215_v0  ;;  %3737 = vmatprep.subr.mxu1 %v4215_v0 }
  0x55   :  { %3725 = vmatpush3.msra.mxu0 %v123_v43  ;;  %3738 = vmatpush3.msra.mxu1 %v128_v44  ;;  %v177_v43 = vld [vmem:[#allocation5 + $0x2a8] sm:$0xff]  ;;  %v72_v44 = vld [vmem:[#allocation2 + $0x20] sm:$0x3] }
  0x56   :  { %3726 = vmatprep.subr.mxu0 %v4215_v0  ;;  %3739 = vmatprep.subr.mxu1 %v4215_v0 }
  0x57   :  { %3727 = vmatpush3.msra.mxu0 %v122_v45  ;;  %3728 = vmatprep.mubr.msk.f32.mxu0 %vm4216_vm0, %v4215_v0  ;;  %v73_v45 = vld [vmem:[#allocation2 + $0x22] sm:$0x3] }
  0x58   :  { %3740 = vmatpush3.msra.mxu1 %v127_v46  ;;  %3741 = vmatprep.mubr.msk.f32.mxu1 %vm4216_vm0, %v4215_v0  ;;  %v186_v46 = vld [vmem:[#allocation5 + $0x2f0] sm:$0xf] }
  0x59   :  { %3729 = vmatmul.mubr.msk.f32.vlgmr.msra.gmra.mxu0 %vm524_vm2, %v62_v47  ;;  %3742 = vmatmul.mubr.msk.f32.vlgmr.msra.gmra.mxu1 %vm524_vm2, %v63_v48  ;;  %v191_v47 = vld [vmem:[#allocation5 + $0x318] sm:$0xf]  ;;  %v185_v48 = vld [vmem:[#allocation5 + $0x2e8] sm:$0xff] }
  0x5a   :  { %3744 = vmatprep.subr.mxu0 %v4215_v0  ;;  %3757 = vmatprep.subr.mxu1 %v4215_v0 }
  0x5b   :  { %3745 = vmatpush3.msk.msra.mxu0 %vm528_vm1, %v136_v49  ;;  %3758 = vmatpush3.msk.msra.mxu1 %vm528_vm1, %v141_v50  ;;  %v190_v49 = vld [vmem:[#allocation5 + $0x310] sm:$0xff]  ;;  %v184_v50 = vld [vmem:[#allocation5 + $0x2e0] sm:$0xff] }
  0x5c   :  { %3746 = vmatprep.subr.mxu0 %v4215_v0  ;;  %3759 = vmatprep.subr.mxu1 %v4215_v0 }
  0x5d   :  { %3747 = vmatpush3.msra.mxu0 %v135_v51  ;;  %3760 = vmatpush3.msra.mxu1 %v140_v52  ;;  %v189_v51 = vld [vmem:[#allocation5 + $0x308] sm:$0xff]  ;;  %v183_v52 = vld [vmem:[#allocation5 + $0x2d8] sm:$0xff] }
  0x5e   :  { %3748 = vmatprep.subr.mxu0 %v4215_v0  ;;  %3761 = vmatprep.subr.mxu1 %v4215_v0 }
  0x5f   :  { %3749 = vmatpush3.msra.mxu0 %v134_v53  ;;  %3762 = vmatpush3.msra.mxu1 %v139_v54  ;;  %v188_v53 = vld [vmem:[#allocation5 + $0x300] sm:$0xff]  ;;  %v182_v54 = vld [vmem:[#allocation5 + $0x2d0] sm:$0xff] }
  0x60   :  { %3750 = vmatprep.subr.mxu0 %v4215_v0  ;;  %3763 = vmatprep.subr.mxu1 %v4215_v0 }
  0x61   :  { %3751 = vmatpush3.msra.mxu0 %v133_v55  ;;  %3764 = vmatpush3.msra.mxu1 %v138_v56  ;;  %v187_v55 = vld [vmem:[#allocation5 + $0x2f8] sm:$0xff] }
  0x62   :  { %3752 = vmatprep.subr.mxu0 %v4215_v0  ;;  %3765 = vmatprep.subr.mxu1 %v4215_v0  ;;  %v74_v56 = vld [vmem:[#allocation2 + $0x24] sm:$0x3] }
  0x63   :  { %3753 = vmatpush3.msra.mxu0 %v132_v57  ;;  %3754 = vmatprep.mubr.msk.f32.mxu0 %vm4216_vm0, %v4215_v0  ;;  %v75_v57 = vld [vmem:[#allocation2 + $0x26] sm:$0x3] }
  0x64   :  { %3766 = vmatpush3.msra.mxu1 %v137_v58  ;;  %3767 = vmatprep.mubr.msk.f32.mxu1 %vm4216_vm0, %v4215_v0  ;;  %v196_v58 = vld [vmem:[#allocation5 + $0x340] sm:$0xf] }
  0x65   :  { %3755 = vmatmul.mubr.msk.f32.vlgmr.msra.gmra.mxu0 %vm524_vm2, %v64_v59  ;;  %3768 = vmatmul.mubr.msk.f32.vlgmr.msra.gmra.mxu1 %vm524_vm2, %v65_v60  ;;  %v201_v59 = vld [vmem:[#allocation5 + $0x368] sm:$0xf]  ;;  %v195_v60 = vld [vmem:[#allocation5 + $0x338] sm:$0xff] }
  0x66   :  { %3770 = vmatprep.subr.mxu0 %v4215_v0  ;;  %3783 = vmatprep.subr.mxu1 %v4215_v0 }
  0x67   :  { %3771 = vmatpush3.msk.msra.mxu0 %vm528_vm1, %v146_v61  ;;  %3784 = vmatpush3.msk.msra.mxu1 %vm528_vm1, %v151_v62  ;;  %v200_v61 = vld [vmem:[#allocation5 + $0x360] sm:$0xff]  ;;  %v194_v62 = vld [vmem:[#allocation5 + $0x330] sm:$0xff] }
  0x68   :  { %3772 = vmatprep.subr.mxu0 %v4215_v0  ;;  %3785 = vmatprep.subr.mxu1 %v4215_v0 }
  0x69   :  { %3773 = vmatpush3.msra.mxu0 %v145_v63  ;;  %3786 = vmatpush3.msra.mxu1 %v150_v1  ;;  %v199_v63 = vld [vmem:[#allocation5 + $0x358] sm:$0xff]  ;;  %v193_v1 = vld [vmem:[#allocation5 + $0x328] sm:$0xff] }
  0x6a   :  { %3774 = vmatprep.subr.mxu0 %v4215_v0  ;;  %3787 = vmatprep.subr.mxu1 %v4215_v0 }
  0x6b   :  { %3775 = vmatpush3.msra.mxu0 %v144_v2  ;;  %3788 = vmatpush3.msra.mxu1 %v149_v3  ;;  %v198_v2 = vld [vmem:[#allocation5 + $0x350] sm:$0xff]  ;;  %v192_v3 = vld [vmem:[#allocation5 + $0x320] sm:$0xff] }
  0x6c   :  { %3776 = vmatprep.subr.mxu0 %v4215_v0  ;;  %3789 = vmatprep.subr.mxu1 %v4215_v0 }
  0x6d   :  { %3777 = vmatpush3.msra.mxu0 %v143_v4  ;;  %3790 = vmatpush3.msra.mxu1 %v148_v5  ;;  %v197_v4 = vld [vmem:[#allocation5 + $0x348] sm:$0xff]  ;;  %v76_v5 = vld [vmem:[#allocation2 + $0x28] sm:$0x3] }
  0x6e   :  { %3778 = vmatprep.subr.mxu0 %v4215_v0  ;;  %3791 = vmatprep.subr.mxu1 %v4215_v0 }
  0x6f   :  { %3779 = vmatpush3.msra.mxu0 %v142_v6  ;;  %3780 = vmatprep.mubr.msk.f32.mxu0 %vm4216_vm0, %v4215_v0  ;;  %v77_v6 = vld [vmem:[#allocation2 + $0x2a] sm:$0x3] }
  0x70   :  { %3792 = vmatpush3.msra.mxu1 %v147_v7  ;;  %3793 = vmatprep.mubr.msk.f32.mxu1 %vm4216_vm0, %v4215_v0  ;;  %v206_v7 = vld [vmem:[#allocation5 + $0x390] sm:$0xf] }
  0x71   :  { %3781 = vmatmul.mubr.msk.f32.vlgmr.msra.gmra.mxu0 %vm524_vm2, %v66_v8  ;;  %3794 = vmatmul.mubr.msk.f32.vlgmr.msra.gmra.mxu1 %vm524_vm2, %v67_v9  ;;  %v211_v8 = vld [vmem:[#allocation5 + $0x3b8] sm:$0xf]  ;;  %v205_v9 = vld [vmem:[#allocation5 + $0x388] sm:$0xff] }
  0x72   :  { %3796 = vmatprep.subr.mxu0 %v4215_v0  ;;  %3809 = vmatprep.subr.mxu1 %v4215_v0 }
  0x73   :  { %3797 = vmatpush3.msk.msra.mxu0 %vm528_vm1, %v156_v10  ;;  %3810 = vmatpush3.msk.msra.mxu1 %vm528_vm1, %v161_v11  ;;  %v210_v10 = vld [vmem:[#allocation5 + $0x3b0] sm:$0xff]  ;;  %v204_v11 = vld [vmem:[#allocation5 + $0x380] sm:$0xff] }
  0x74   :  { %3798 = vmatprep.subr.mxu0 %v4215_v0  ;;  %3811 = vmatprep.subr.mxu1 %v4215_v0 }
  0x75   :  { %3799 = vmatpush3.msra.mxu0 %v155_v12  ;;  %3812 = vmatpush3.msra.mxu1 %v160_v13  ;;  %v209_v12 = vld [vmem:[#allocation5 + $0x3a8] sm:$0xff]  ;;  %v203_v13 = vld [vmem:[#allocation5 + $0x378] sm:$0xff] }
  0x76   :  { %3800 = vmatprep.subr.mxu0 %v4215_v0  ;;  %3813 = vmatprep.subr.mxu1 %v4215_v0 }
  0x77   :  { %3801 = vmatpush3.msra.mxu0 %v154_v14  ;;  %3814 = vmatpush3.msra.mxu1 %v159_v15  ;;  %v208_v14 = vld [vmem:[#allocation5 + $0x3a0] sm:$0xff]  ;;  %v202_v15 = vld [vmem:[#allocation5 + $0x370] sm:$0xff] }
  0x78   :  { %3802 = vmatprep.subr.mxu0 %v4215_v0  ;;  %3815 = vmatprep.subr.mxu1 %v4215_v0 }
  0x79   :  { %3803 = vmatpush3.msra.mxu0 %v153_v16  ;;  %3816 = vmatpush3.msra.mxu1 %v158_v17  ;;  %v207_v16 = vld [vmem:[#allocation5 + $0x398] sm:$0xff]  ;;  %v78_v17 = vld [vmem:[#allocation2 + $0x2c] sm:$0x3] }
  0x7a   :  { %3804 = vmatprep.subr.mxu0 %v4215_v0  ;;  %3817 = vmatprep.subr.mxu1 %v4215_v0 }
  0x7b   :  { %3805 = vmatpush3.msra.mxu0 %v152_v18  ;;  %3806 = vmatprep.mubr.msk.f32.mxu0 %vm4216_vm0, %v4215_v0  ;;  %v79_v18 = vld [vmem:[#allocation2 + $0x2e] sm:$0x3] }
  0x7c   :  { %3818 = vmatpush3.msra.mxu1 %v157_v19  ;;  %3819 = vmatprep.mubr.msk.f32.mxu1 %vm4216_vm0, %v4215_v0  ;;  %v216_v19 = vld [vmem:[#allocation5 + $0x3e0] sm:$0xf] }
  0x7d   :  { %3807 = vmatmul.mubr.msk.f32.vlgmr.msra.gmra.mxu0 %vm524_vm2, %v68_v20  ;;  %3820 = vmatmul.mubr.msk.f32.vlgmr.msra.gmra.mxu1 %vm524_vm2, %v69_v21  ;;  %v221_v20 = vld [vmem:[#allocation5 + $0x408] sm:$0xf]  ;;  %v215_v21 = vld [vmem:[#allocation5 + $0x3d8] sm:$0xff] }
  0x7e   :  { %3822 = vmatprep.subr.mxu0 %v4215_v0  ;;  %3835 = vmatprep.subr.mxu1 %v4215_v0 }
  0x7f   :  { %3823 = vmatpush3.msk.msra.mxu0 %vm528_vm1, %v166_v22  ;;  %3836 = vmatpush3.msk.msra.mxu1 %vm528_vm1, %v171_v23  ;;  %v220_v22 = vld [vmem:[#allocation5 + $0x400] sm:$0xff]  ;;  %v214_v23 = vld [vmem:[#allocation5 + $0x3d0] sm:$0xff] }
  0x80   :  { %3824 = vmatprep.subr.mxu0 %v4215_v0  ;;  %3837 = vmatprep.subr.mxu1 %v4215_v0 }
  0x81   :  { %3825 = vmatpush3.msra.mxu0 %v165_v24  ;;  %3838 = vmatpush3.msra.mxu1 %v170_v25  ;;  %v219_v24 = vld [vmem:[#allocation5 + $0x3f8] sm:$0xff]  ;;  %v213_v25 = vld [vmem:[#allocation5 + $0x3c8] sm:$0xff] }
  0x82   :  { %3826 = vmatprep.subr.mxu0 %v4215_v0  ;;  %3839 = vmatprep.subr.mxu1 %v4215_v0 }
  0x83   :  { %3827 = vmatpush3.msra.mxu0 %v164_v26  ;;  %3840 = vmatpush3.msra.mxu1 %v169_v27  ;;  %v218_v26 = vld [vmem:[#allocation5 + $0x3f0] sm:$0xff]  ;;  %v212_v27 = vld [vmem:[#allocation5 + $0x3c0] sm:$0xff] }
  0x84   :  { %3828 = vmatprep.subr.mxu0 %v4215_v0  ;;  %3841 = vmatprep.subr.mxu1 %v4215_v0 }
  0x85   :  { %3829 = vmatpush3.msra.mxu0 %v163_v28  ;;  %3842 = vmatpush3.msra.mxu1 %v168_v29  ;;  %v217_v28 = vld [vmem:[#allocation5 + $0x3e8] sm:$0xff] }
  0x86   :  { %3830 = vmatprep.subr.mxu0 %v4215_v0  ;;  %3843 = vmatprep.subr.mxu1 %v4215_v0  ;;  %v80_v29 = vld [vmem:[#allocation2 + $0x30] sm:$0x3] }
  0x87   :  { %3831 = vmatpush3.msra.mxu0 %v162_v30  ;;  %3832 = vmatprep.mubr.msk.f32.mxu0 %vm4216_vm0, %v4215_v0  ;;  %v81_v30 = vld [vmem:[#allocation2 + $0x32] sm:$0x3] }
  0x88   :  { %3844 = vmatpush3.msra.mxu1 %v167_v31  ;;  %3845 = vmatprep.mubr.msk.f32.mxu1 %vm4216_vm0, %v4215_v0  ;;  %v226_v31 = vld [vmem:[#allocation5 + $0x430] sm:$0xf] }
  0x89   :  { %3833 = vmatmul.mubr.msk.f32.vlgmr.msra.gmra.mxu0 %vm524_vm2, %v70_v32  ;;  %3846 = vmatmul.mubr.msk.f32.vlgmr.msra.gmra.mxu1 %vm524_vm2, %v71_v33  ;;  %v231_v32 = vld [vmem:[#allocation5 + $0x458] sm:$0xf]  ;;  %v225_v33 = vld [vmem:[#allocation5 + $0x428] sm:$0xff] }
  0x8a   :  { %3848 = vmatprep.subr.mxu0 %v4215_v0  ;;  %3861 = vmatprep.subr.mxu1 %v4215_v0 }
  0x8b   :  { %3849 = vmatpush3.msk.msra.mxu0 %vm528_vm1, %v176_v34  ;;  %3862 = vmatpush3.msk.msra.mxu1 %vm528_vm1, %v181_v35  ;;  %v230_v34 = vld [vmem:[#allocation5 + $0x450] sm:$0xff]  ;;  %v224_v35 = vld [vmem:[#allocation5 + $0x420] sm:$0xff] }
  0x8c   :  { %3850 = vmatprep.subr.mxu0 %v4215_v0  ;;  %3863 = vmatprep.subr.mxu1 %v4215_v0 }
  0x8d   :  { %3851 = vmatpush3.msra.mxu0 %v175_v36  ;;  %3864 = vmatpush3.msra.mxu1 %v180_v37  ;;  %v229_v36 = vld [vmem:[#allocation5 + $0x448] sm:$0xff]  ;;  %v223_v37 = vld [vmem:[#allocation5 + $0x418] sm:$0xff] }
  0x8e   :  { %3852 = vmatprep.subr.mxu0 %v4215_v0  ;;  %3865 = vmatprep.subr.mxu1 %v4215_v0 }
  0x8f   :  { %3853 = vmatpush3.msra.mxu0 %v174_v38  ;;  %3866 = vmatpush3.msra.mxu1 %v179_v39  ;;  %v228_v38 = vld [vmem:[#allocation5 + $0x440] sm:$0xff]  ;;  %v222_v39 = vld [vmem:[#allocation5 + $0x410] sm:$0xff] }
  0x90   :  { %3854 = vmatprep.subr.mxu0 %v4215_v0  ;;  %3867 = vmatprep.subr.mxu1 %v4215_v0 }
  0x91   :  { %3855 = vmatpush3.msra.mxu0 %v173_v40  ;;  %3868 = vmatpush3.msra.mxu1 %v178_v41  ;;  %v227_v40 = vld [vmem:[#allocation5 + $0x438] sm:$0xff]  ;;  %v82_v41 = vld [vmem:[#allocation2 + $0x34] sm:$0x3] }
  0x92   :  { %3856 = vmatprep.subr.mxu0 %v4215_v0  ;;  %3869 = vmatprep.subr.mxu1 %v4215_v0 }
  0x93   :  { %3857 = vmatpush3.msra.mxu0 %v172_v42  ;;  %3858 = vmatprep.mubr.msk.f32.mxu0 %vm4216_vm0, %v4215_v0  ;;  %v83_v42 = vld [vmem:[#allocation2 + $0x36] sm:$0x3] }
  0x94   :  { %3870 = vmatpush3.msra.mxu1 %v177_v43  ;;  %3871 = vmatprep.mubr.msk.f32.mxu1 %vm4216_vm0, %v4215_v0  ;;  %v236_v43 = vld [vmem:[#allocation5 + $0x480] sm:$0xf] }
  0x95   :  { %3859 = vmatmul.mubr.msk.f32.vlgmr.msra.gmra.mxu0 %vm524_vm2, %v72_v44  ;;  %3872 = vmatmul.mubr.msk.f32.vlgmr.msra.gmra.mxu1 %vm524_vm2, %v73_v45  ;;  %v241_v44 = vld [vmem:[#allocation5 + $0x4a8] sm:$0xf]  ;;  %v235_v45 = vld [vmem:[#allocation5 + $0x478] sm:$0xff] }
  0x96   :  { %3874 = vmatprep.subr.mxu0 %v4215_v0  ;;  %3887 = vmatprep.subr.mxu1 %v4215_v0 }
  0x97   :  { %3875 = vmatpush3.msk.msra.mxu0 %vm528_vm1, %v186_v46  ;;  %3888 = vmatpush3.msk.msra.mxu1 %vm528_vm1, %v191_v47  ;;  %v240_v46 = vld [vmem:[#allocation5 + $0x4a0] sm:$0xff]  ;;  %v234_v47 = vld [vmem:[#allocation5 + $0x470] sm:$0xff] }
  0x98   :  { %3876 = vmatprep.subr.mxu0 %v4215_v0  ;;  %3889 = vmatprep.subr.mxu1 %v4215_v0 }
  0x99   :  { %3877 = vmatpush3.msra.mxu0 %v185_v48  ;;  %3890 = vmatpush3.msra.mxu1 %v190_v49  ;;  %v239_v48 = vld [vmem:[#allocation5 + $0x498] sm:$0xff]  ;;  %v233_v49 = vld [vmem:[#allocation5 + $0x468] sm:$0xff] }
  0x9a   :  { %3878 = vmatprep.subr.mxu0 %v4215_v0  ;;  %3891 = vmatprep.subr.mxu1 %v4215_v0 }
  0x9b   :  { %3879 = vmatpush3.msra.mxu0 %v184_v50  ;;  %3892 = vmatpush3.msra.mxu1 %v189_v51  ;;  %v238_v50 = vld [vmem:[#allocation5 + $0x490] sm:$0xff]  ;;  %v232_v51 = vld [vmem:[#allocation5 + $0x460] sm:$0xff] }
  0x9c   :  { %3880 = vmatprep.subr.mxu0 %v4215_v0  ;;  %3893 = vmatprep.subr.mxu1 %v4215_v0 }
  0x9d   :  { %3881 = vmatpush3.msra.mxu0 %v183_v52  ;;  %3894 = vmatpush3.msra.mxu1 %v188_v53  ;;  %v237_v52 = vld [vmem:[#allocation5 + $0x488] sm:$0xff]  ;;  %v84_v53 = vld [vmem:[#allocation2 + $0x38] sm:$0x3] }
  0x9e   :  { %3882 = vmatprep.subr.mxu0 %v4215_v0  ;;  %3895 = vmatprep.subr.mxu1 %v4215_v0 }
  0x9f   :  { %3883 = vmatpush3.msra.mxu0 %v182_v54  ;;  %3884 = vmatprep.mubr.msk.f32.mxu0 %vm4216_vm0, %v4215_v0  ;;  %v85_v54 = vld [vmem:[#allocation2 + $0x3a] sm:$0x3] }
  0xa0   :  { %3896 = vmatpush3.msra.mxu1 %v187_v55  ;;  %3897 = vmatprep.mubr.msk.f32.mxu1 %vm4216_vm0, %v4215_v0  ;;  %v246_v55 = vld [vmem:[#allocation5 + $0x4d0] sm:$0xf] }
  0xa1   :  { %3885 = vmatmul.mubr.msk.f32.vlgmr.msra.gmra.mxu0 %vm524_vm2, %v74_v56  ;;  %3898 = vmatmul.mubr.msk.f32.vlgmr.msra.gmra.mxu1 %vm524_vm2, %v75_v57  ;;  %v251_v56 = vld [vmem:[#allocation5 + $0x4f8] sm:$0xf]  ;;  %v245_v57 = vld [vmem:[#allocation5 + $0x4c8] sm:$0xff] }
  0xa2   :  { %3900 = vmatprep.subr.mxu0 %v4215_v0  ;;  %3913 = vmatprep.subr.mxu1 %v4215_v0 }
  0xa3   :  { %3901 = vmatpush3.msk.msra.mxu0 %vm528_vm1, %v196_v58  ;;  %3914 = vmatpush3.msk.msra.mxu1 %vm528_vm1, %v201_v59  ;;  %v250_v58 = vld [vmem:[#allocation5 + $0x4f0] sm:$0xff]  ;;  %v244_v59 = vld [vmem:[#allocation5 + $0x4c0] sm:$0xff] }
  0xa4   :  { %3902 = vmatprep.subr.mxu0 %v4215_v0  ;;  %3915 = vmatprep.subr.mxu1 %v4215_v0 }
  0xa5   :  { %3903 = vmatpush3.msra.mxu0 %v195_v60  ;;  %3916 = vmatpush3.msra.mxu1 %v200_v61  ;;  %v249_v60 = vld [vmem:[#allocation5 + $0x4e8] sm:$0xff]  ;;  %v243_v61 = vld [vmem:[#allocation5 + $0x4b8] sm:$0xff] }
  0xa6   :  { %3904 = vmatprep.subr.mxu0 %v4215_v0  ;;  %3917 = vmatprep.subr.mxu1 %v4215_v0 }
  0xa7   :  { %3905 = vmatpush3.msra.mxu0 %v194_v62  ;;  %3918 = vmatpush3.msra.mxu1 %v199_v63  ;;  %v248_v62 = vld [vmem:[#allocation5 + $0x4e0] sm:$0xff]  ;;  %v242_v63 = vld [vmem:[#allocation5 + $0x4b0] sm:$0xff] }
  0xa8   :  { %3906 = vmatprep.subr.mxu0 %v4215_v0  ;;  %3919 = vmatprep.subr.mxu1 %v4215_v0 }
  0xa9   :  { %3907 = vmatpush3.msra.mxu0 %v193_v1  ;;  %3920 = vmatpush3.msra.mxu1 %v198_v2  ;;  %v247_v1 = vld [vmem:[#allocation5 + $0x4d8] sm:$0xff]  ;;  %v86_v2 = vld [vmem:[#allocation2 + $0x3c] sm:$0x3] }
  0xaa   :  { %3908 = vmatprep.subr.mxu0 %v4215_v0  ;;  %3921 = vmatprep.subr.mxu1 %v4215_v0 }
  0xab   :  { %3909 = vmatpush3.msra.mxu0 %v192_v3  ;;  %3910 = vmatprep.mubr.msk.f32.mxu0 %vm4216_vm0, %v4215_v0  ;;  %v87_v3 = vld [vmem:[#allocation2 + $0x3e] sm:$0x3] }
  0xac   :  { %3922 = vmatpush3.msra.mxu1 %v197_v4  ;;  %3923 = vmatprep.mubr.msk.f32.mxu1 %vm4216_vm0, %v4215_v0  ;;  %v256_v4 = vld [vmem:[#allocation5 + $0x520] sm:$0xf] }
  0xad   :  { %3911 = vmatmul.mubr.msk.f32.vlgmr.msra.gmra.mxu0 %vm524_vm2, %v76_v5  ;;  %3924 = vmatmul.mubr.msk.f32.vlgmr.msra.gmra.mxu1 %vm524_vm2, %v77_v6  ;;  %v261_v5 = vld [vmem:[#allocation5 + $0x548] sm:$0xf]  ;;  %v255_v6 = vld [vmem:[#allocation5 + $0x518] sm:$0xff] }
  0xae   :  { %3926 = vmatprep.subr.mxu0 %v4215_v0  ;;  %3939 = vmatprep.subr.mxu1 %v4215_v0 }
  0xaf   :  { %3927 = vmatpush3.msk.msra.mxu0 %vm528_vm1, %v206_v7  ;;  %3940 = vmatpush3.msk.msra.mxu1 %vm528_vm1, %v211_v8  ;;  %v260_v7 = vld [vmem:[#allocation5 + $0x540] sm:$0xff]  ;;  %v254_v8 = vld [vmem:[#allocation5 + $0x510] sm:$0xff] }
  0xb0   :  { %3928 = vmatprep.subr.mxu0 %v4215_v0  ;;  %3941 = vmatprep.subr.mxu1 %v4215_v0 }
  0xb1   :  { %3929 = vmatpush3.msra.mxu0 %v205_v9  ;;  %3942 = vmatpush3.msra.mxu1 %v210_v10  ;;  %v259_v9 = vld [vmem:[#allocation5 + $0x538] sm:$0xff]  ;;  %v253_v10 = vld [vmem:[#allocation5 + $0x508] sm:$0xff] }
  0xb2   :  { %3930 = vmatprep.subr.mxu0 %v4215_v0  ;;  %3943 = vmatprep.subr.mxu1 %v4215_v0 }
  0xb3   :  { %3931 = vmatpush3.msra.mxu0 %v204_v11  ;;  %3944 = vmatpush3.msra.mxu1 %v209_v12  ;;  %v258_v11 = vld [vmem:[#allocation5 + $0x530] sm:$0xff]  ;;  %v252_v12 = vld [vmem:[#allocation5 + $0x500] sm:$0xff] }
  0xb4   :  { %3932 = vmatprep.subr.mxu0 %v4215_v0  ;;  %3945 = vmatprep.subr.mxu1 %v4215_v0 }
  0xb5   :  { %3933 = vmatpush3.msra.mxu0 %v203_v13  ;;  %3946 = vmatpush3.msra.mxu1 %v208_v14  ;;  %v257_v13 = vld [vmem:[#allocation5 + $0x528] sm:$0xff]  ;;  %v88_v14 = vld [vmem:[#allocation2 + $0x40] sm:$0x3] }
  0xb6   :  { %3934 = vmatprep.subr.mxu0 %v4215_v0  ;;  %3947 = vmatprep.subr.mxu1 %v4215_v0 }
  0xb7   :  { %3935 = vmatpush3.msra.mxu0 %v202_v15  ;;  %3936 = vmatprep.mubr.msk.f32.mxu0 %vm4216_vm0, %v4215_v0  ;;  %v89_v15 = vld [vmem:[#allocation2 + $0x42] sm:$0x3] }
  0xb8   :  { %3948 = vmatpush3.msra.mxu1 %v207_v16  ;;  %3949 = vmatprep.mubr.msk.f32.mxu1 %vm4216_vm0, %v4215_v0  ;;  %v3316_v16 = vld [vmem:[#allocation7] ss:$0 sm:$0xff] }
  0xb9   :  { %3937 = vmatmul.mubr.msk.f32.vlgmr.msra.gmra.mxu0 %vm524_vm2, %v78_v17  ;;  %3950 = vmatmul.mubr.msk.f32.vlgmr.msra.gmra.mxu1 %vm524_vm2, %v79_v18  ;;  %v3317_v17 = vld [vmem:[#allocation7 + $0x1] ss:$0 sm:$0xff]  ;;  %v266_v18 = vld [vmem:[#allocation5 + $0x570] sm:$0xf] }
  0xba   :  { %3952 = vmatprep.subr.mxu0 %v4215_v0  ;;  %3965 = vmatprep.subr.mxu1 %v4215_v0 }
  0xbb   :  { %3953 = vmatpush3.msk.msra.mxu0 %vm528_vm1, %v216_v19  ;;  %3966 = vmatpush3.msk.msra.mxu1 %vm528_vm1, %v221_v20  ;;  %v271_v19 = vld [vmem:[#allocation5 + $0x598] sm:$0xf] }
  0xbc   :  { %3954 = vmatprep.subr.mxu0 %v4215_v0  ;;  %3967 = vmatprep.subr.mxu1 %v4215_v0 }
  0xbd   :  { %3955 = vmatpush3.msra.mxu0 %v215_v21  ;;  %3968 = vmatpush3.msra.mxu1 %v220_v22  ;;  %v265_v22 = vld [vmem:[#allocation5 + $0x568] sm:$0xff] }
  0xbe   :  { %3956 = vmatprep.subr.mxu0 %v4215_v0  ;;  %3969 = vmatprep.subr.mxu1 %v4215_v0 }
  0xbf   :  { %3957 = vmatpush3.msra.mxu0 %v214_v23  ;;  %3970 = vmatpush3.msra.mxu1 %v219_v24  ;;  %v270_v23 = vld [vmem:[#allocation5 + $0x590] sm:$0xff] }
  0xc0   :  { %3958 = vmatprep.subr.mxu0 %v4215_v0  ;;  %3971 = vmatprep.subr.mxu1 %v4215_v0 }
  0xc1   :  { %3959 = vmatpush3.msra.mxu0 %v213_v25  ;;  %3972 = vmatpush3.msra.mxu1 %v218_v26 }
  0xc2   :  { %3960 = vmatprep.subr.mxu0 %v4215_v0  ;;  %3973 = vmatprep.subr.mxu1 %v4215_v0 }
  0xc3   :  { %3961 = vmatpush3.msra.mxu0 %v212_v27  ;;  %3962 = vmatprep.mubr.msk.f32.mxu0 %vm4216_vm0, %v4215_v0 }
  0xc4   :  { %3974 = vmatpush3.msra.mxu1 %v217_v28  ;;  %3975 = vmatprep.mubr.msk.f32.mxu1 %vm4216_vm0, %v4215_v0  ;;  %v264_v28 = vld [vmem:[#allocation5 + $0x560] sm:$0xff] }
  0xc5   :  { %3963 = vmatmul.mubr.msk.f32.vlgmr.msra.gmra.mxu0 %vm524_vm2, %v80_v29  ;;  %3976 = vmatmul.mubr.msk.f32.vlgmr.msra.gmra.mxu1 %vm524_vm2, %v81_v30  ;;  %v269_v29 = vld [vmem:[#allocation5 + $0x588] sm:$0xff]  ;;  %v263_v30 = vld [vmem:[#allocation5 + $0x558] sm:$0xff] }
  0xc6   :  { %3978 = vmatprep.subr.mxu0 %v4215_v0  ;;  %3991 = vmatprep.subr.mxu1 %v4215_v0 }
  0xc7   :  { %3979 = vmatpush3.msk.msra.mxu0 %vm528_vm1, %v226_v31  ;;  %3992 = vmatpush3.msk.msra.mxu1 %vm528_vm1, %v231_v32  ;;  %v268_v31 = vld [vmem:[#allocation5 + $0x580] sm:$0xff]  ;;  %v262_v32 = vld [vmem:[#allocation5 + $0x550] sm:$0xff] }
  0xc8   :  { %3980 = vmatprep.subr.mxu0 %v4215_v0  ;;  %3993 = vmatprep.subr.mxu1 %v4215_v0 }
  0xc9   :  { %3981 = vmatpush3.msra.mxu0 %v225_v33  ;;  %3994 = vmatpush3.msra.mxu1 %v230_v34  ;;  %v267_v33 = vld [vmem:[#allocation5 + $0x578] sm:$0xff] }
  0xca   :  { %3982 = vmatprep.subr.mxu0 %v4215_v0  ;;  %3995 = vmatprep.subr.mxu1 %v4215_v0  ;;  %v90_v34 = vld [vmem:[#allocation2 + $0x44] sm:$0x3] }
  0xcb   :  { %3983 = vmatpush3.msra.mxu0 %v224_v35  ;;  %3996 = vmatpush3.msra.mxu1 %v229_v36  ;;  %v91_v35 = vld [vmem:[#allocation2 + $0x46] sm:$0x3]  ;;  %v3318_v36 = vld [vmem:[#allocation7 + $0x2] ss:$0 sm:$0xff] }
  0xcc   :  { %3984 = vmatprep.subr.mxu0 %v4215_v0  ;;  %3997 = vmatprep.subr.mxu1 %v4215_v0 }
  0xcd   :  { %3985 = vmatpush3.msra.mxu0 %v223_v37  ;;  %3998 = vmatpush3.msra.mxu1 %v228_v38  ;;  %v3319_v37 = vld [vmem:[#allocation7 + $0x3] ss:$0 sm:$0xff] }
  0xce   :  { %3986 = vmatprep.subr.mxu0 %v4215_v0  ;;  %3999 = vmatprep.subr.mxu1 %v4215_v0 }
  0xcf   :  { %3987 = vmatpush3.msra.mxu0 %v222_v39  ;;  %3988 = vmatprep.mubr.msk.f32.mxu0 %vm4216_vm0, %v4215_v0 }
  0xd0   :  { %4000 = vmatpush3.msra.mxu1 %v227_v40  ;;  %4001 = vmatprep.mubr.msk.f32.mxu1 %vm4216_vm0, %v4215_v0 }
  0xd1   :  { %3989 = vmatmul.mubr.msk.f32.vlgmr.msra.gmra.mxu0 %vm524_vm2, %v82_v41  ;;  %4002 = vmatmul.mubr.msk.f32.vlgmr.msra.gmra.mxu1 %vm524_vm2, %v83_v42 }
  0xd2   :  { %4004 = vmatprep.subr.mxu0 %v4215_v0  ;;  %4017 = vmatprep.subr.mxu1 %v4215_v0 }
  0xd3   :  { %4005 = vmatpush3.msk.msra.mxu0 %vm528_vm1, %v236_v43  ;;  %4018 = vmatpush3.msk.msra.mxu1 %vm528_vm1, %v241_v44  ;;  %v3320_v44 = vld [vmem:[#allocation7 + $0x4] ss:$0 sm:$0xff] }
  0xd4   :  { %4006 = vmatprep.subr.mxu0 %v4215_v0  ;;  %4019 = vmatprep.subr.mxu1 %v4215_v0 }
  0xd5   :  { %4007 = vmatpush3.msra.mxu0 %v235_v45  ;;  %4020 = vmatpush3.msra.mxu1 %v240_v46  ;;  %v3321_v45 = vld [vmem:[#allocation7 + $0x5] ss:$0 sm:$0xff] }
  0xd6   :  { %4008 = vmatprep.subr.mxu0 %v4215_v0  ;;  %4021 = vmatprep.subr.mxu1 %v4215_v0 }
  0xd7   :  { %4009 = vmatpush3.msra.mxu0 %v234_v47  ;;  %4022 = vmatpush3.msra.mxu1 %v239_v48 }
  0xd8   :  { %4010 = vmatprep.subr.mxu0 %v4215_v0  ;;  %4023 = vmatprep.subr.mxu1 %v4215_v0 }
  0xd9   :  { %4011 = vmatpush3.msra.mxu0 %v233_v49  ;;  %4024 = vmatpush3.msra.mxu1 %v238_v50 }
  0xda   :  { %4012 = vmatprep.subr.mxu0 %v4215_v0  ;;  %4025 = vmatprep.subr.mxu1 %v4215_v0 }
  0xdb   :  { %4013 = vmatpush3.msra.mxu0 %v232_v51  ;;  %4014 = vmatprep.mubr.msk.f32.mxu0 %vm4216_vm0, %v4215_v0  ;;  %v3322_v51 = vld [vmem:[#allocation7 + $0x6] ss:$0 sm:$0xff] }
  0xdc   :  { %4026 = vmatpush3.msra.mxu1 %v237_v52  ;;  %4027 = vmatprep.mubr.msk.f32.mxu1 %vm4216_vm0, %v4215_v0  ;;  %v3323_v52 = vld [vmem:[#allocation7 + $0x7] ss:$0 sm:$0xff] }
  0xdd   :  { %4015 = vmatmul.mubr.msk.f32.vlgmr.msra.gmra.mxu0 %vm524_vm2, %v84_v53  ;;  %4028 = vmatmul.mubr.msk.f32.vlgmr.msra.gmra.mxu1 %vm524_vm2, %v85_v54 }
  0xde   :  { %4030 = vmatprep.subr.mxu0 %v4215_v0  ;;  %4043 = vmatprep.subr.mxu1 %v4215_v0 }
  0xdf   :  { %4031 = vmatpush3.msk.msra.mxu0 %vm528_vm1, %v246_v55  ;;  %4044 = vmatpush3.msk.msra.mxu1 %vm528_vm1, %v251_v56 }
  0xe0   :  { %4032 = vmatprep.subr.mxu0 %v4215_v0  ;;  %4045 = vmatprep.subr.mxu1 %v4215_v0 }
  0xe1   :  { %4033 = vmatpush3.msra.mxu0 %v245_v57  ;;  %4046 = vmatpush3.msra.mxu1 %v250_v58 }
  0xe2   :  { %4034 = vmatprep.subr.mxu0 %v4215_v0  ;;  %4047 = vmatprep.subr.mxu1 %v4215_v0 }
  0xe3   :  { %4035 = vmatpush3.msra.mxu0 %v244_v59  ;;  %4048 = vmatpush3.msra.mxu1 %v249_v60  ;;  %v3324_v59 = vld [vmem:[#allocation7 + $0x8] ss:$0 sm:$0xff]  ;;  %v3325_v60 = vld [vmem:[#allocation7 + $0x9] ss:$0 sm:$0xff] }
  0xe4   :  { %4036 = vmatprep.subr.mxu0 %v4215_v0  ;;  %4049 = vmatprep.subr.mxu1 %v4215_v0 }
  0xe5   :  { %4037 = vmatpush3.msra.mxu0 %v243_v61  ;;  %4050 = vmatpush3.msra.mxu1 %v248_v62 }
  0xe6   :  { %4038 = vmatprep.subr.mxu0 %v4215_v0  ;;  %4051 = vmatprep.subr.mxu1 %v4215_v0 }
  0xe7   :  { %4039 = vmatpush3.msra.mxu0 %v242_v63  ;;  %4040 = vmatprep.mubr.msk.f32.mxu0 %vm4216_vm0, %v4215_v0 }
  0xe8   :  { %4052 = vmatpush3.msra.mxu1 %v247_v1  ;;  %4053 = vmatprep.mubr.msk.f32.mxu1 %vm4216_vm0, %v4215_v0 }
  0xe9   :  { %4041 = vmatmul.mubr.msk.f32.vlgmr.msra.gmra.mxu0 %vm524_vm2, %v86_v2  ;;  %4054 = vmatmul.mubr.msk.f32.vlgmr.msra.gmra.mxu1 %vm524_vm2, %v87_v3 }
  0xea   :  { %4056 = vmatprep.subr.mxu0 %v4215_v0  ;;  %4069 = vmatprep.subr.mxu1 %v4215_v0 }
  0xeb   :  { %4057 = vmatpush3.msk.msra.mxu0 %vm528_vm1, %v256_v4  ;;  %4070 = vmatpush3.msk.msra.mxu1 %vm528_vm1, %v261_v5  ;;  %v3326_v4 = vld [vmem:[#allocation7 + $0xa] ss:$0 sm:$0xff]  ;;  %v3327_v5 = vld [vmem:[#allocation7 + $0xb] ss:$0 sm:$0xff] }
  0xec   :  { %4058 = vmatprep.subr.mxu0 %v4215_v0  ;;  %4071 = vmatprep.subr.mxu1 %v4215_v0 }
  0xed   :  { %4059 = vmatpush3.msra.mxu0 %v255_v6  ;;  %4072 = vmatpush3.msra.mxu1 %v260_v7 }
  0xee   :  { %4060 = vmatprep.subr.mxu0 %v4215_v0  ;;  %4073 = vmatprep.subr.mxu1 %v4215_v0 }
  0xef   :  { %4061 = vmatpush3.msra.mxu0 %v254_v8  ;;  %4074 = vmatpush3.msra.mxu1 %v259_v9 }
  0xf0   :  { %4062 = vmatprep.subr.mxu0 %v4215_v0  ;;  %4075 = vmatprep.subr.mxu1 %v4215_v0 }
  0xf1   :  { %4063 = vmatpush3.msra.mxu0 %v253_v10  ;;  %4076 = vmatpush3.msra.mxu1 %v258_v11 }
  0xf2   :  { %4064 = vmatprep.subr.mxu0 %v4215_v0  ;;  %4077 = vmatprep.subr.mxu1 %v4215_v0 }
  0xf3   :  { %4065 = vmatpush3.msra.mxu0 %v252_v12  ;;  %4066 = vmatprep.mubr.msk.f32.mxu0 %vm4216_vm0, %v4215_v0  ;;  %v3328_v12 = vld [vmem:[#allocation7 + $0xc] ss:$0 sm:$0xff] }
  0xf4   :  { %4078 = vmatpush3.msra.mxu1 %v257_v13  ;;  %4079 = vmatprep.mubr.msk.f32.mxu1 %vm4216_vm0, %v4215_v0  ;;  %v3329_v13 = vld [vmem:[#allocation7 + $0xd] ss:$0 sm:$0xff] }
  0xf5   :  { %4067 = vmatmul.mubr.msk.f32.vlgmr.msra.gmra.mxu0 %vm524_vm2, %v88_v14  ;;  %4080 = vmatmul.mubr.msk.f32.vlgmr.msra.gmra.mxu1 %vm524_vm2, %v89_v15  ;;  %v598_v20 = vpop.f32.mrf.mxu0  ;;  %v674_v21 = vpop.f32.mrf.mxu1 }
  0xf6   :  { %4082 = vmatprep.subr.mxu0 %v4215_v0  ;;  %4095 = vmatprep.subr.mxu1 %v4215_v0  ;;  %v599_v24 = vadd.f32 %v3316_v16, %v598_v20  ;;  %v675_v25 = vadd.f32 %v3317_v17, %v674_v21  ;;  %v3330_v20 = vld [vmem:[#allocation7 + $0xe] ss:$0 sm:$0xff]  ;;  %v3331_v21 = vld [vmem:[#allocation7 + $0xf] ss:$0 sm:$0xff] }
  0xf7   :  { %4083 = vmatpush3.msk.msra.mxu0 %vm528_vm1, %v266_v18  ;;  %4096 = vmatpush3.msk.msra.mxu1 %vm528_vm1, %v271_v19  ;;  %v3652_v26 = vpop.f32.mrf.mxu0  ;;  %v3665_v27 = vpop.f32.mrf.mxu1 }
  0xf8   :  { %4084 = vmatprep.subr.mxu0 %v4215_v0  ;;  %4097 = vmatprep.subr.mxu1 %v4215_v0  ;;  %3262 = vst [vmem:[#allocation8] sm:$0x3] %v599_v24  ;;  %3263 = vst [vmem:[#allocation8 + $0x2] sm:$0x3] %v675_v25 }
  0xf9   :  { %4085 = vmatpush3.msra.mxu0 %v265_v22  ;;  %4098 = vmatpush3.msra.mxu1 %v270_v23 }
  0xfa   :  { %4086 = vmatprep.subr.mxu0 %v4215_v0  ;;  %4099 = vmatprep.subr.mxu1 %v4215_v0 }
  0xfb   :  { %4087 = vmatpush3.msra.mxu0 %v264_v28  ;;  %4100 = vmatpush3.msra.mxu1 %v269_v29  ;;  %v3332_v28 = vld [vmem:[#allocation7 + $0x10] ss:$0 sm:$0xff]  ;;  %v3333_v29 = vld [vmem:[#allocation7 + $0x11] ss:$0 sm:$0xff] }
  0xfc   :  { %4088 = vmatprep.subr.mxu0 %v4215_v0  ;;  %4101 = vmatprep.subr.mxu1 %v4215_v0 }
  0xfd   :  { %4089 = vmatpush3.msra.mxu0 %v263_v30  ;;  %4102 = vmatpush3.msra.mxu1 %v268_v31 }
  0xfe   :  { %4090 = vmatprep.subr.mxu0 %v4215_v0  ;;  %4103 = vmatprep.subr.mxu1 %v4215_v0 }
  0xff   :  { %4091 = vmatpush3.msra.mxu0 %v262_v32  ;;  %4092 = vmatprep.mubr.msk.f32.mxu0 %vm4216_vm0, %v4215_v0 }
 0x100   :  { %4104 = vmatpush3.msra.mxu1 %v267_v33  ;;  %4105 = vmatprep.mubr.msk.f32.mxu1 %vm4216_vm0, %v4215_v0 }
 0x101   :  { %4093 = vmatmul.mubr.msk.f32.vlgmr.msra.gmra.mxu0 %vm524_vm2, %v90_v34  ;;  %4106 = vmatmul.mubr.msk.f32.vlgmr.msra.gmra.mxu1 %vm524_vm2, %v91_v35  ;;  %v750_v38 = vpop.f32.mrf.mxu0  ;;  %v826_v39 = vpop.f32.mrf.mxu1 }
 0x102   :  { %v751_v40 = vadd.f32 %v3318_v36, %v750_v38  ;;  %v827_v41 = vadd.f32 %v3319_v37, %v826_v39  ;;  %v3334_v36 = vld [vmem:[#allocation7 + $0x12] ss:$0 sm:$0xff]  ;;  %v3335_v37 = vld [vmem:[#allocation7 + $0x13] ss:$0 sm:$0xff] }
 0x103   :  { %v3678_v42 = vpop.f32.mrf.mxu0  ;;  %v3691_v43 = vpop.f32.mrf.mxu1 }
 0x104   :  { %3264 = vst [vmem:[#allocation8 + $0x4] sm:$0x3] %v751_v40  ;;  %3265 = vst [vmem:[#allocation8 + $0x6] sm:$0x3] %v827_v41 }
 0x10d   :  { %v902_v46 = vpop.f32.mrf.mxu0  ;;  %v978_v47 = vpop.f32.mrf.mxu1 }
 0x10e   :  { %v903_v48 = vadd.f32 %v3320_v44, %v902_v46  ;;  %v979_v49 = vadd.f32 %v3321_v45, %v978_v47  ;;  %v3336_v44 = vld [vmem:[#allocation7 + $0x14] ss:$0 sm:$0xff]  ;;  %v3337_v45 = vld [vmem:[#allocation7 + $0x15] ss:$0 sm:$0xff] }
 0x10f   :  { %v3704_v50 = vpop.f32.mrf.mxu0  ;;  %v3717_v0 = vpop.f32.mrf.mxu1 }
 0x110   :  { %3266 = vst [vmem:[#allocation8 + $0x8] sm:$0x3] %v903_v48  ;;  %3267 = vst [vmem:[#allocation8 + $0xa] sm:$0x3] %v979_v49 }
 0x119   :  { %v1054_v53 = vpop.f32.mrf.mxu0  ;;  %v1130_v54 = vpop.f32.mrf.mxu1 }
 0x11a   :  { %v1055_v55 = vadd.f32 %v3322_v51, %v1054_v53  ;;  %v1131_v56 = vadd.f32 %v3323_v52, %v1130_v54  ;;  %v3338_v51 = vld [vmem:[#allocation7 + $0x16] ss:$0 sm:$0xff]  ;;  %v3339_v52 = vld [vmem:[#allocation7 + $0x17] ss:$0 sm:$0xff] }
 0x11b   :  { %v3730_v57 = vpop.f32.mrf.mxu0  ;;  %v3743_v58 = vpop.f32.mrf.mxu1 }
 0x11c   :  { %3268 = vst [vmem:[#allocation8 + $0xc] sm:$0x3] %v1055_v55  ;;  %3269 = vst [vmem:[#allocation8 + $0xe] sm:$0x3] %v1131_v56 }
 0x125   :  { %v1206_v61 = vpop.f32.mrf.mxu0  ;;  %v1282_v62 = vpop.f32.mrf.mxu1 }
 0x126   :  { %v1207_v63 = vadd.f32 %v3324_v59, %v1206_v61  ;;  %v1283_v1 = vadd.f32 %v3325_v60, %v1282_v62  ;;  %v3340_v59 = vld [vmem:[#allocation7 + $0x18] ss:$0 sm:$0xff]  ;;  %v3341_v60 = vld [vmem:[#allocation7 + $0x19] ss:$0 sm:$0xff] }
 0x127   :  { %v3756_v2 = vpop.f32.mrf.mxu0  ;;  %v3769_v3 = vpop.f32.mrf.mxu1 }
 0x128   :  { %3270 = vst [vmem:[#allocation8 + $0x10] sm:$0x3] %v1207_v63  ;;  %3271 = vst [vmem:[#allocation8 + $0x12] sm:$0x3] %v1283_v1 }
 0x131   :  { %v1358_v6 = vpop.f32.mrf.mxu0  ;;  %v1434_v7 = vpop.f32.mrf.mxu1 }
 0x132   :  { %v1359_v8 = vadd.f32 %v3326_v4, %v1358_v6  ;;  %v1435_v9 = vadd.f32 %v3327_v5, %v1434_v7  ;;  %v3342_v4 = vld [vmem:[#allocation7 + $0x1a] ss:$0 sm:$0xff]  ;;  %v3343_v5 = vld [vmem:[#allocation7 + $0x1b] ss:$0 sm:$0xff] }
 0x133   :  { %v3782_v10 = vpop.f32.mrf.mxu0  ;;  %v3795_v11 = vpop.f32.mrf.mxu1 }
 0x134   :  { %3272 = vst [vmem:[#allocation8 + $0x14] sm:$0x3] %v1359_v8  ;;  %3273 = vst [vmem:[#allocation8 + $0x16] sm:$0x3] %v1435_v9 }
 0x13d   :  { %v1510_v14 = vpop.f32.mrf.mxu0  ;;  %v1586_v15 = vpop.f32.mrf.mxu1 }
 0x13e   :  { %v1511_v16 = vadd.f32 %v3328_v12, %v1510_v14  ;;  %v1587_v17 = vadd.f32 %v3329_v13, %v1586_v15  ;;  %v3344_v12 = vld [vmem:[#allocation7 + $0x1c] ss:$0 sm:$0xff]  ;;  %v3345_v13 = vld [vmem:[#allocation7 + $0x1d] ss:$0 sm:$0xff] }
 0x13f   :  { %v3808_v18 = vpop.f32.mrf.mxu0  ;;  %v3821_v19 = vpop.f32.mrf.mxu1 }
 0x140   :  { %3274 = vst [vmem:[#allocation8 + $0x18] sm:$0x3] %v1511_v16  ;;  %3275 = vst [vmem:[#allocation8 + $0x1a] sm:$0x3] %v1587_v17 }
 0x149   :  { %v1662_v22 = vpop.f32.mrf.mxu0  ;;  %v1738_v23 = vpop.f32.mrf.mxu1 }
 0x14a   :  { %v1663_v24 = vadd.f32 %v3330_v20, %v1662_v22  ;;  %v1739_v25 = vadd.f32 %v3331_v21, %v1738_v23  ;;  %v3346_v20 = vld [vmem:[#allocation7 + $0x1e] ss:$0 sm:$0xff]  ;;  %v3347_v21 = vld [vmem:[#allocation7 + $0x1f] ss:$0 sm:$0xff] }
 0x14b   :  { %v3834_v26 = vpop.f32.mrf.mxu0  ;;  %v3847_v27 = vpop.f32.mrf.mxu1 }
 0x14c   :  { %3276 = vst [vmem:[#allocation8 + $0x1c] sm:$0x3] %v1663_v24  ;;  %3277 = vst [vmem:[#allocation8 + $0x1e] sm:$0x3] %v1739_v25 }
 0x155   :  { %v1814_v30 = vpop.f32.mrf.mxu0  ;;  %v1890_v31 = vpop.f32.mrf.mxu1 }
 0x156   :  { %v1815_v32 = vadd.f32 %v3332_v28, %v1814_v30  ;;  %v1891_v33 = vadd.f32 %v3333_v29, %v1890_v31  ;;  %v3348_v28 = vld [vmem:[#allocation7 + $0x20] ss:$0 sm:$0xff]  ;;  %v3349_v29 = vld [vmem:[#allocation7 + $0x21] ss:$0 sm:$0xff] }
 0x157   :  { %v3860_v34 = vpop.f32.mrf.mxu0  ;;  %v3873_v35 = vpop.f32.mrf.mxu1 }
 0x158   :  { %3278 = vst [vmem:[#allocation8 + $0x20] sm:$0x3] %v1815_v32  ;;  %3279 = vst [vmem:[#allocation8 + $0x22] sm:$0x3] %v1891_v33 }
 0x161   :  { %v1966_v38 = vpop.f32.mrf.mxu0  ;;  %v2042_v39 = vpop.f32.mrf.mxu1 }
 0x162   :  { %v1967_v40 = vadd.f32 %v3334_v36, %v1966_v38  ;;  %v2043_v41 = vadd.f32 %v3335_v37, %v2042_v39  ;;  %v3350_v36 = vld [vmem:[#allocation7 + $0x22] ss:$0 sm:$0xff]  ;;  %v3351_v37 = vld [vmem:[#allocation7 + $0x23] ss:$0 sm:$0xff] }
 0x163   :  { %v3886_v42 = vpop.f32.mrf.mxu0  ;;  %v3899_v43 = vpop.f32.mrf.mxu1 }
 0x164   :  { %3280 = vst [vmem:[#allocation8 + $0x24] sm:$0x3] %v1967_v40  ;;  %3281 = vst [vmem:[#allocation8 + $0x26] sm:$0x3] %v2043_v41 }
 0x16d   :  { %v2118_v46 = vpop.f32.mrf.mxu0  ;;  %v2194_v47 = vpop.f32.mrf.mxu1 }
 0x16e   :  { %v2119_v48 = vadd.f32 %v3336_v44, %v2118_v46  ;;  %v2195_v49 = vadd.f32 %v3337_v45, %v2194_v47 }
 0x16f   :  { %v3912_v50 = vpop.f32.mrf.mxu0  ;;  %v3925_v0 = vpop.f32.mrf.mxu1 }
 0x170   :  { %3282 = vst [vmem:[#allocation8 + $0x28] sm:$0x3] %v2119_v48  ;;  %3283 = vst [vmem:[#allocation8 + $0x2a] sm:$0x3] %v2195_v49 }
 0x179   :  { %v2270_v53 = vpop.f32.mrf.mxu0  ;;  %v2346_v54 = vpop.f32.mrf.mxu1 }
 0x17a   :  { %v2271_v55 = vadd.f32 %v3338_v51, %v2270_v53  ;;  %v2347_v56 = vadd.f32 %v3339_v52, %v2346_v54 }
 0x17b   :  { %v3938_v57 = vpop.f32.mrf.mxu0  ;;  %v3951_v58 = vpop.f32.mrf.mxu1 }
 0x17c   :  { %3284 = vst [vmem:[#allocation8 + $0x2c] sm:$0x3] %v2271_v55  ;;  %3285 = vst [vmem:[#allocation8 + $0x2e] sm:$0x3] %v2347_v56 }
 0x185   :  { %v2422_v61 = vpop.f32.mrf.mxu0  ;;  %v2498_v62 = vpop.f32.mrf.mxu1 }
 0x186   :  { %v2423_v63 = vadd.f32 %v3340_v59, %v2422_v61  ;;  %v2499_v1 = vadd.f32 %v3341_v60, %v2498_v62 }
 0x187   :  { %v3964_v2 = vpop.f32.mrf.mxu0  ;;  %v3977_v3 = vpop.f32.mrf.mxu1 }
 0x188   :  { %3286 = vst [vmem:[#allocation8 + $0x30] sm:$0x3] %v2423_v63  ;;  %3287 = vst [vmem:[#allocation8 + $0x32] sm:$0x3] %v2499_v1 }
 0x191   :  { %v2574_v6 = vpop.f32.mrf.mxu0  ;;  %v2650_v7 = vpop.f32.mrf.mxu1 }
 0x192   :  { %v2575_v8 = vadd.f32 %v3342_v4, %v2574_v6  ;;  %v2651_v9 = vadd.f32 %v3343_v5, %v2650_v7 }
 0x193   :  { %v3990_v10 = vpop.f32.mrf.mxu0  ;;  %v4003_v11 = vpop.f32.mrf.mxu1 }
 0x194   :  { %3288 = vst [vmem:[#allocation8 + $0x34] sm:$0x3] %v2575_v8  ;;  %3289 = vst [vmem:[#allocation8 + $0x36] sm:$0x3] %v2651_v9 }
 0x19d   :  { %v2726_v14 = vpop.f32.mrf.mxu0  ;;  %v2802_v15 = vpop.f32.mrf.mxu1 }
 0x19e   :  { %v2727_v16 = vadd.f32 %v3344_v12, %v2726_v14  ;;  %v2803_v17 = vadd.f32 %v3345_v13, %v2802_v15 }
 0x19f   :  { %v4016_v18 = vpop.f32.mrf.mxu0  ;;  %v4029_v19 = vpop.f32.mrf.mxu1 }
 0x1a0   :  { %3290 = vst [vmem:[#allocation8 + $0x38] sm:$0x3] %v2727_v16  ;;  %3291 = vst [vmem:[#allocation8 + $0x3a] sm:$0x3] %v2803_v17 }
 0x1a9   :  { %v2878_v22 = vpop.f32.mrf.mxu0  ;;  %v2954_v23 = vpop.f32.mrf.mxu1 }
 0x1aa   :  { %v2879_v24 = vadd.f32 %v3346_v20, %v2878_v22  ;;  %v2955_v25 = vadd.f32 %v3347_v21, %v2954_v23 }
 0x1ab   :  { %v4042_v26 = vpop.f32.mrf.mxu0  ;;  %v4055_v27 = vpop.f32.mrf.mxu1 }
 0x1ac   :  { %3292 = vst [vmem:[#allocation8 + $0x3c] sm:$0x3] %v2879_v24  ;;  %3293 = vst [vmem:[#allocation8 + $0x3e] sm:$0x3] %v2955_v25 }
 0x1b5   :  { %v3030_v30 = vpop.f32.mrf.mxu0  ;;  %v3106_v31 = vpop.f32.mrf.mxu1 }
 0x1b6   :  { %v3031_v32 = vadd.f32 %v3348_v28, %v3030_v30  ;;  %v3107_v33 = vadd.f32 %v3349_v29, %v3106_v31 }
 0x1b7   :  { %v4068_v34 = vpop.f32.mrf.mxu0  ;;  %v4081_v35 = vpop.f32.mrf.mxu1 }
 0x1b8   :  { %3294 = vst [vmem:[#allocation8 + $0x40] sm:$0x3] %v3031_v32  ;;  %3295 = vst [vmem:[#allocation8 + $0x42] sm:$0x3] %v3107_v33 }
 0x1c1   :  { %v3182_v38 = vpop.f32.mrf.mxu0  ;;  %v3258_v39 = vpop.f32.mrf.mxu1 }
 0x1c2   :  { %v3183_v40 = vadd.f32 %v3350_v36, %v3182_v38  ;;  %v3259_v41 = vadd.f32 %v3351_v37, %v3258_v39 }
 0x1c3   :  { %v4094_v42 = vpop.f32.mrf.mxu0  ;;  %v4107_v43 = vpop.f32.mrf.mxu1 }
 0x1c4   :  { %3296 = vst [vmem:[#allocation8 + $0x44] sm:$0x3] %v3183_v40  ;;  %3297 = vst [vmem:[#allocation8 + $0x46] sm:$0x3] %v3259_v41 }
 0x1c5   :  { %4191 = shalt.err (!%p4188_p5)
}
 0x1c6   :  { %3309 = dma.vmem_to_hbm [thread:$0]  %s3304_s2, 1152, %s4583_s3, [#allocation4], %s4210_s22, %s4210_s22, %s4211_s23  }
 0x1c7   :  { %4204 = dma.done.wait [#allocation4], 1152  }
 0x1c8   :  { %4205 = vsyncadd [#allocation4], 4294966144 }
 0x1c9   :  { %3313 = vsyncpa [#allocation3], 1 }
 0x1ca   :  { %3314 = vsyncpa [#allocation6], 1 }
 0x1cb   :  { %3315 = vsyncpa [#allocation4], 1 }

</bundles_post_ra>
